<compile_context>
chip_gen: v7x
topology: tpu7x:2x2x1
jax: 0.10.0
libtpu: 0.0.40
codegen_flags: <defaults>
</compile_context>

<pallas_src>
import functools
import math

import jax
import jax.numpy as jnp
from jax.experimental import pallas as pl
from jax.experimental.pallas import tpu as pltpu

EMBED_DIM = 32
HALF_DIM = EMBED_DIM // 2     # 16
IN_DIM = 2 + EMBED_DIM        # 34
HID = 128
OUT_DIM = 2
OUT_PAD = 8                   # output rows padded to a full sublane group
X_PAD = 8                     # packed [x0, x1, t, 0, 0, 0, 0, 0] input width


def _round_up(x: int, m: int) -> int:
    return ((x + m - 1) // m) * m


def _freqs() -> jnp.ndarray:
    """(16,) sinusoidal frequencies, matching the PyTorch reference."""
    scale = math.log(10000.0) / (HALF_DIM - 1)
    return jnp.exp(jnp.arange(HALF_DIM, dtype=jnp.float32) * -scale)


def get_timestep_embedding(timesteps: jnp.ndarray, dim: int) -> jnp.ndarray:
    """Pure-JAX sinusoidal timestep embedding (reference path only)."""
    half = dim // 2
    emb = math.log(10000.0) / (half - 1)
    emb = jnp.exp(jnp.arange(half, dtype=jnp.float32) * -emb)
    emb = timesteps.astype(jnp.float32)[:, None] * emb[None, :]
    return jnp.concatenate([jnp.sin(emb), jnp.cos(emb)], axis=-1)


# ----------------------------------------------------------------------------
# Fused kernel: embedding + 3-layer MLP (transposed, lane-dense output)
# ----------------------------------------------------------------------------
def _denoiser_kernel(xin_ref, freq_ref, phase_ref,
                     w1a_ref, w1b_ref, b1_ref,
                     w2_ref, b2_ref, w3t_ref, b3_ref, o_ref):
    xin = xin_ref[...]                       # (tile_b, 8)  f32: [x0, x1, t, 0..]
    t = xin_ref[:, 2:3]                      # (tile_b, 1)  f32

    # Sinusoidal embedding in one shot:
    #   emb = sin(t * [f, f] + [0, pi/2]) == [sin(t*f), cos(t*f)]   (f32, EUP)
    ang = t * freq_ref[...] + phase_ref[...]                  # (tile_b, 32)
    emb = jnp.sin(ang)

    # Layer 1: x-part (K=8, zero rows for t/pad lanes) + embedding part (K=32).
    h1 = (
        jnp.dot(xin.astype(jnp.bfloat16), w1a_ref[...],
                preferred_element_type=jnp.float32)
        + jnp.dot(emb.astype(jnp.bfloat16), w1b_ref[...],
                  preferred_element_type=jnp.float32)
        + b1_ref[...]
    )
    h1 = jnp.maximum(h1, 0.0)

    # Layer 2
    h2 = jnp.dot(h1.astype(jnp.bfloat16), w2_ref[...],
                 preferred_element_type=jnp.float32) + b2_ref[...]
    h2 = jnp.maximum(h2, 0.0)

    # Layer 3, transposed so the output block (OUT_PAD, tile_b) is lane-dense:
    #   (OUT_PAD, HID) contract (tile_b, HID)  ->  (OUT_PAD, tile_b)
    o = jax.lax.dot_general(
        w3t_ref[...], h2.astype(jnp.bfloat16),
        dimension_numbers=(((1,), (1,)), ((), ())),
        preferred_element_type=jnp.float32)
    o_ref[...] = o + b3_ref[...]


def _choose_tile(batch: int, requested: int):
    """Pick (tile_b, padded_b). Multi-tile => tile_b multiple of 128."""
    b8 = _round_up(max(batch, 1), 8)
    if b8 <= 256:
        return b8, b8                                   # single small tile
    half = _round_up(-(-b8 // 2), 128)                  # >= 2 grid steps (v7x megacore)
    tile = max(128, min(_round_up(requested, 128), half))
    return tile, _round_up(b8, tile)


def _vmem_budget_bytes(tile_b: int) -> int:
    """Honest VMEM footprint for this tile size (bf16 weights, f32 live)."""
    w_bytes = ((X_PAD + EMBED_DIM) * HID + HID * HID + OUT_PAD * HID) * 2   # bf16 weights
    b_bytes = (2 * HID + OUT_PAD + 2 * EMBED_DIM) * 4                        # f32 biases + freq/phase
    io = 2 * tile_b * (X_PAD + OUT_PAD) * 4                                  # double-buffered in/out tiles
    live = 6 * tile_b * HID * 4                                              # h1/h2/emb/bf16 copies + slack
    total = int(2 * (w_bytes + b_bytes + io + live))
    return int(min(max(total, 8 << 20), 40 << 20))       # stays well under v7x's 64 MiB


@functools.partial(jax.jit, static_argnames=("tile_b",))
def denoiser_forward(x_t, t, params, tile_b: int = 2048):
    """Full Denoiser.forward (embedding + MLP) in one Pallas kernel call."""
    w1, b1, w2, b2, w3, b3 = params
    B = x_t.shape[0]

    # Kernel-layout operands: bf16 MXU weights, f32 biases.
    w1a = jnp.zeros((X_PAD, HID), jnp.float32).at[:2].set(w1[:2]).astype(jnp.bfloat16)
    w1b = w1[2:].astype(jnp.bfloat16)                                   # (32,128) sin|cos rows
    w2b = w2.astype(jnp.bfloat16)
    w3t = (jnp.zeros((OUT_PAD, HID), jnp.float32)
           .at[:OUT_DIM].set(w3.T).astype(jnp.bfloat16))
    b1r = b1.reshape(1, HID).astype(jnp.float32)
    b2r = b2.reshape(1, HID).astype(jnp.float32)
    b3c = jnp.zeros((OUT_PAD, 1), jnp.float32).at[:OUT_DIM, 0].set(b3)

    f = _freqs()
    freq2 = jnp.concatenate([f, f])[None, :]                            # (1, 32)
    phase2 = jnp.concatenate(
        [jnp.zeros((HALF_DIM,), jnp.float32),
         jnp.full((HALF_DIM,), math.pi / 2.0, jnp.float32)])[None, :]   # (1, 32)

    tile_b, padded_b = _choose_tile(B, tile_b)
    grid = (padded_b // tile_b,)

    # Single packed (padded_b, 8) f32 input: [x0, x1, t, 0, 0, 0, 0, 0].
    packed = jnp.zeros((padded_b, X_PAD), jnp.float32)
    packed = packed.at[:B, :2].set(x_t.reshape(B, -1).astype(jnp.float32))
    packed = packed.at[:B, 2].set(t.astype(jnp.float32).reshape(B))

    batch_in = pl.BlockSpec((tile_b, X_PAD), lambda i: (i, 0))
    const = lambda a: pl.BlockSpec(a.shape, lambda i: (0, 0))

    out_t = pl.pallas_call(
        _denoiser_kernel,
        out_shape=jax.ShapeDtypeStruct((OUT_PAD, padded_b), jnp.float32),
        grid=grid,
        in_specs=[
            batch_in,                       # packed [x, t]
            const(freq2), const(phase2),    # embedding tables
            const(w1a), const(w1b), const(b1r),
            const(w2b), const(b2r),
            const(w3t), const(b3c),
        ],
        out_specs=pl.BlockSpec((OUT_PAD, tile_b), lambda i: (0, i)),
        compiler_params=pltpu.CompilerParams(
            dimension_semantics=("parallel",),
            vmem_limit_bytes=_vmem_budget_bytes(tile_b),
        ),
    )(packed, freq2, phase2, w1a, w1b, b1r, w2b, b2r, w3t, b3c)

    # Drop the padded rows / batch and transpose back to (B, 2).
    return out_t[:OUT_DIM, :B].T


# ----------------------------------------------------------------------------
# Params & pure-JAX reference
# ----------------------------------------------------------------------------
def init_params(key):
    """nn.Linear-style init (U[-1/sqrt(fan_in), 1/sqrt(fan_in)]), matmul layout."""
    ks = jax.random.split(key, 6)

    def linear(kw, kb, fan_in, fan_out):
        bound = 1.0 / math.sqrt(fan_in)
        w = jax.random.uniform(kw, (fan_in, fan_out), jnp.float32, -bound, bound)
        b = jax.random.uniform(kb, (fan_out,), jnp.float32, -bound, bound)
        return w, b

    w1, b1 = linear(ks[0], ks[1], IN_DIM, HID)
    w2, b2 = linear(ks[2], ks[3], HID, HID)
    w3, b3 = linear(ks[4], ks[5], HID, OUT_DIM)
    return (w1, b1, w2, b2, w3, b3)


def denoiser_reference(x_t, t, params):
    """Pure-JAX reference (explicit concat path) for correctness checking."""
    w1, b1, w2, b2, w3, b3 = params
    B = x_t.shape[0]
    t_emb = get_timestep_embedding(t, EMBED_DIM)
    combined = jnp.concatenate([x_t.reshape(B, -1), t_emb], axis=1)
    h1 = jnp.maximum(combined @ w1 + b1, 0.0)
    h2 = jnp.maximum(h1 @ w2 + b2, 0.0)
    return h2 @ w3 + b3


if __name__ == "__main__":
    key = jax.random.PRNGKey(0)
    k_param, k_x, k_t = jax.random.split(key, 3)

    B = 8
    params = init_params(k_param)
    x_t = jax.random.normal(k_x, (B, 2), dtype=jnp.float32)
    t = jax.random.randint(k_t, (B,), 0, 1000).astype(jnp.float32)

    out = jax.block_until_ready(denoiser_forward(x_t, t, params))
    ref = jax.block_until_ready(denoiser_reference(x_t, t, params))

    assert out.shape == (B, OUT_DIM), out.shape
    err = float(jnp.max(jnp.abs(out - ref)))
    # bf16 MXU operands with f32 accumulation -> looser tolerance than pure f32.
    assert err < 5e-2, f"max abs err {err}"
    print("KERNEL_OK")
</pallas_src>

<mosaic_0001>
module attributes {stable_mosaic.version = 11 : i64} {
  func.func @_denoiser_kernel(%arg0: i32, %arg1: memref<8x8xf32, #tpu.memory_space<vmem>>, %arg2: memref<1x32xf32, #tpu.memory_space<vmem>>, %arg3: memref<1x32xf32, #tpu.memory_space<vmem>>, %arg4: memref<8x128xbf16, #tpu.memory_space<vmem>>, %arg5: memref<32x128xbf16, #tpu.memory_space<vmem>>, %arg6: memref<1x128xf32, #tpu.memory_space<vmem>>, %arg7: memref<128x128xbf16, #tpu.memory_space<vmem>>, %arg8: memref<1x128xf32, #tpu.memory_space<vmem>>, %arg9: memref<8x128xbf16, #tpu.memory_space<vmem>>, %arg10: memref<8x1xf32, #tpu.memory_space<vmem>>, %arg11: memref<8x8xf32, #tpu.memory_space<vmem>>) attributes {dimension_semantics = [#tpu.dimension_semantics<parallel>], iteration_bounds = array<i64: 1>, scalar_prefetch = 0 : i64, scratch_operands = 0 : i64, tpu.core_type = #tpu.core_type<tc>, window_params = [{transform_indices = @transform_0, window_bounds = array<i64: 8, 8>}, {pipeline_mode = #tpu.pipeline_mode<synchronous>, transform_indices = @transform_1, window_bounds = array<i64: 1, 32>}, {pipeline_mode = #tpu.pipeline_mode<synchronous>, transform_indices = @transform_2, window_bounds = array<i64: 1, 32>}, {pipeline_mode = #tpu.pipeline_mode<synchronous>, transform_indices = @transform_3, window_bounds = array<i64: 8, 128>}, {pipeline_mode = #tpu.pipeline_mode<synchronous>, transform_indices = @transform_4, window_bounds = array<i64: 32, 128>}, {pipeline_mode = #tpu.pipeline_mode<synchronous>, transform_indices = @transform_5, window_bounds = array<i64: 1, 128>}, {pipeline_mode = #tpu.pipeline_mode<synchronous>, transform_indices = @transform_6, window_bounds = array<i64: 128, 128>}, {pipeline_mode = #tpu.pipeline_mode<synchronous>, transform_indices = @transform_7, window_bounds = array<i64: 1, 128>}, {pipeline_mode = #tpu.pipeline_mode<synchronous>, transform_indices = @transform_8, window_bounds = array<i64: 8, 128>}, {pipeline_mode = #tpu.pipeline_mode<synchronous>, transform_indices = @transform_9, window_bounds = array<i64: 8, 1>}, {transform_indices = @transform_10, window_bounds = array<i64: 8, 8>}]} {
    %c0 = arith.constant 0 : index
    %c0_0 = arith.constant 0 : index
    %0 = vector.load %arg1[%c0, %c0_0] : memref<8x8xf32, #tpu.memory_space<vmem>>, vector<8x8xf32>
    %c0_1 = arith.constant 0 : index
    %c2 = arith.constant 2 : index
    %1 = vector.load %arg1[%c0_1, %c2] : memref<8x8xf32, #tpu.memory_space<vmem>>, vector<8x1xf32>
    %c0_2 = arith.constant 0 : index
    %c0_3 = arith.constant 0 : index
    %2 = vector.load %arg2[%c0_2, %c0_3] : memref<1x32xf32, #tpu.memory_space<vmem>>, vector<1x32xf32>
    %3 = vector.broadcast %1 : vector<8x1xf32> to vector<8x32xf32>
    %4 = vector.broadcast %2 : vector<1x32xf32> to vector<8x32xf32>
    %5 = arith.mulf %3, %4 : vector<8x32xf32>
    %c0_4 = arith.constant 0 : index
    %c0_5 = arith.constant 0 : index
    %6 = vector.load %arg3[%c0_4, %c0_5] : memref<1x32xf32, #tpu.memory_space<vmem>>, vector<1x32xf32>
    %7 = vector.broadcast %6 : vector<1x32xf32> to vector<8x32xf32>
    %8 = arith.addf %5, %7 : vector<8x32xf32>
    %9 = math.sin %8 : vector<8x32xf32>
    %10 = arith.truncf %0 : vector<8x8xf32> to vector<8x8xbf16>
    %c0_6 = arith.constant 0 : index
    %c0_7 = arith.constant 0 : index
    %11 = vector.load %arg4[%c0_6, %c0_7] : memref<8x128xbf16, #tpu.memory_space<vmem>>, vector<8x128xbf16>
    %cst = arith.constant dense<0.000000e+00> : vector<8x128xf32>
    %12 = tpu.matmul %10, %11, %cst {dimension_numbers = #tpu.dot_dimension_numbers<[1], [0], [0], [1], [0, 0, 1, 1], [], []>} : vector<8x8xbf16>, vector<8x128xbf16>, vector<8x128xf32> -> vector<8x128xf32>
    %13 = arith.truncf %9 : vector<8x32xf32> to vector<8x32xbf16>
    %c0_8 = arith.constant 0 : index
    %c0_9 = arith.constant 0 : index
    %14 = vector.load %arg5[%c0_8, %c0_9] : memref<32x128xbf16, #tpu.memory_space<vmem>>, vector<32x128xbf16>
    %cst_10 = arith.constant dense<0.000000e+00> : vector<8x128xf32>
    %15 = tpu.matmul %13, %14, %cst_10 {dimension_numbers = #tpu.dot_dimension_numbers<[1], [0], [0], [1], [0, 0, 1, 1], [], []>} : vector<8x32xbf16>, vector<32x128xbf16>, vector<8x128xf32> -> vector<8x128xf32>
    %16 = arith.addf %12, %15 : vector<8x128xf32>
    %c0_11 = arith.constant 0 : index
    %c0_12 = arith.constant 0 : index
    %17 = vector.load %arg6[%c0_11, %c0_12] : memref<1x128xf32, #tpu.memory_space<vmem>>, vector<1x128xf32>
    %18 = vector.broadcast %17 : vector<1x128xf32> to vector<8x128xf32>
    %19 = arith.addf %16, %18 : vector<8x128xf32>
    %cst_13 = arith.constant 0.000000e+00 : f32
    %20 = vector.broadcast %cst_13 : f32 to vector<8x128xf32>
    %21 = arith.maximumf %19, %20 : vector<8x128xf32>
    %22 = arith.truncf %21 : vector<8x128xf32> to vector<8x128xbf16>
    %c0_14 = arith.constant 0 : index
    %c0_15 = arith.constant 0 : index
    %23 = vector.load %arg7[%c0_14, %c0_15] : memref<128x128xbf16, #tpu.memory_space<vmem>>, vector<128x128xbf16>
    %cst_16 = arith.constant dense<0.000000e+00> : vector<8x128xf32>
    %24 = tpu.matmul %22, %23, %cst_16 {dimension_numbers = #tpu.dot_dimension_numbers<[1], [0], [0], [1], [0, 0, 1, 1], [], []>} : vector<8x128xbf16>, vector<128x128xbf16>, vector<8x128xf32> -> vector<8x128xf32>
    %c0_17 = arith.constant 0 : index
    %c0_18 = arith.constant 0 : index
    %25 = vector.load %arg8[%c0_17, %c0_18] : memref<1x128xf32, #tpu.memory_space<vmem>>, vector<1x128xf32>
    %26 = vector.broadcast %25 : vector<1x128xf32> to vector<8x128xf32>
    %27 = arith.addf %24, %26 : vector<8x128xf32>
    %cst_19 = arith.constant 0.000000e+00 : f32
    %28 = vector.broadcast %cst_19 : f32 to vector<8x128xf32>
    %29 = arith.maximumf %27, %28 : vector<8x128xf32>
    %c0_20 = arith.constant 0 : index
    %c0_21 = arith.constant 0 : index
    %30 = vector.load %arg9[%c0_20, %c0_21] : memref<8x128xbf16, #tpu.memory_space<vmem>>, vector<8x128xbf16>
    %31 = arith.truncf %29 : vector<8x128xf32> to vector<8x128xbf16>
    %cst_22 = arith.constant dense<0.000000e+00> : vector<8x8xf32>
    %32 = tpu.matmul %30, %31, %cst_22 {dimension_numbers = #tpu.dot_dimension_numbers<[1], [1], [0], [0], [0, 0, 1, 0], [], []>} : vector<8x128xbf16>, vector<8x128xbf16>, vector<8x8xf32> -> vector<8x8xf32>
    %c0_23 = arith.constant 0 : index
    %c0_24 = arith.constant 0 : index
    %33 = vector.load %arg10[%c0_23, %c0_24] : memref<8x1xf32, #tpu.memory_space<vmem>>, vector<8x1xf32>
    %34 = vector.broadcast %33 : vector<8x1xf32> to vector<8x8xf32>
    %35 = arith.addf %32, %34 : vector<8x8xf32>
    %c0_25 = arith.constant 0 : index
    %c0_26 = arith.constant 0 : index
    %36 = vector.load %arg11[%c0_25, %c0_26] : memref<8x8xf32, #tpu.memory_space<vmem>>, vector<8x8xf32>
    tpu.vector_store %arg11[%c0_25, %c0_26], %35 {strides = array<i32>} : memref<8x8xf32, #tpu.memory_space<vmem>>, vector<8x8xf32>,
    return
  }
  func.func @transform_0(%arg0: i32) -> (i32, i32) {
    %c0_i32 = arith.constant 0 : i32
    %c0_i32_0 = arith.constant 0 : i32
    return %arg0, %c0_i32 : i32, i32
  }
  func.func @transform_1(%arg0: i32) -> (i32, i32) {
    %c0_i32 = arith.constant 0 : i32
    %c0_i32_0 = arith.constant 0 : i32
    %c0_i32_1 = arith.constant 0 : i32
    return %c0_i32, %c0_i32_0 : i32, i32
  }
  func.func @transform_2(%arg0: i32) -> (i32, i32) {
    %c0_i32 = arith.constant 0 : i32
    %c0_i32_0 = arith.constant 0 : i32
    %c0_i32_1 = arith.constant 0 : i32
    return %c0_i32, %c0_i32_0 : i32, i32
  }
  func.func @transform_3(%arg0: i32) -> (i32, i32) {
    %c0_i32 = arith.constant 0 : i32
    %c0_i32_0 = arith.constant 0 : i32
    %c0_i32_1 = arith.constant 0 : i32
    return %c0_i32, %c0_i32_0 : i32, i32
  }
  func.func @transform_4(%arg0: i32) -> (i32, i32) {
    %c0_i32 = arith.constant 0 : i32
    %c0_i32_0 = arith.constant 0 : i32
    %c0_i32_1 = arith.constant 0 : i32
    return %c0_i32, %c0_i32_0 : i32, i32
  }
  func.func @transform_5(%arg0: i32) -> (i32, i32) {
    %c0_i32 = arith.constant 0 : i32
    %c0_i32_0 = arith.constant 0 : i32
    %c0_i32_1 = arith.constant 0 : i32
    return %c0_i32, %c0_i32_0 : i32, i32
  }
  func.func @transform_6(%arg0: i32) -> (i32, i32) {
    %c0_i32 = arith.constant 0 : i32
    %c0_i32_0 = arith.constant 0 : i32
    %c0_i32_1 = arith.constant 0 : i32
    return %c0_i32, %c0_i32_0 : i32, i32
  }
  func.func @transform_7(%arg0: i32) -> (i32, i32) {
    %c0_i32 = arith.constant 0 : i32
    %c0_i32_0 = arith.constant 0 : i32
    %c0_i32_1 = arith.constant 0 : i32
    return %c0_i32, %c0_i32_0 : i32, i32
  }
  func.func @transform_8(%arg0: i32) -> (i32, i32) {
    %c0_i32 = arith.constant 0 : i32
    %c0_i32_0 = arith.constant 0 : i32
    %c0_i32_1 = arith.constant 0 : i32
    return %c0_i32, %c0_i32_0 : i32, i32
  }
  func.func @transform_9(%arg0: i32) -> (i32, i32) {
    %c0_i32 = arith.constant 0 : i32
    %c0_i32_0 = arith.constant 0 : i32
    %c0_i32_1 = arith.constant 0 : i32
    return %c0_i32, %c0_i32_0 : i32, i32
  }
  func.func @transform_10(%arg0: i32) -> (i32, i32) {
    %c0_i32 = arith.constant 0 : i32
    %c0_i32_0 = arith.constant 0 : i32
    return %c0_i32, %arg0 : i32, i32
  }
}

</mosaic_0001>

<bundles_post_ra>
// kernel: denoiser_forward.1
= control target key start
LH: loop header
LB: loop body
LE: loop exit
PB: predicated region body
PF: predicated region fallthrough
CT: control target
= control target key end

     0   :  { %v554_v0 = vmov 2   ;;  %v555_v2 = vmov 0.0   ;;  %vm556_vm0 = vmmov 0   ;;  %v557_v24 = vmov 683565275   ;;  %s724_s0 = inlined_call_operand.vmem [shape: f32[8,8], index: 0, kind: input, shape index: {}]   ;;  %s725_s4 = inlined_call_operand.vmem [shape: bf16[32,128], index: 4, kind: input, shape index: {}]   ;;  %s726_s6 = inlined_call_operand.vmem [shape: bf16[128,128], index: 6, kind: input, shape index: {}]   ;;  %s727_s1 = inlined_call_operand.vmem [shape: f32[1,32], index: 1, kind: input, shape index: {}]   ;;  %s728_s2 = inlined_call_operand.vmem [shape: f32[1,32], index: 2, kind: input, shape index: {}]   ;;  %s729_s3 = inlined_call_operand.vmem [shape: bf16[8,128], index: 3, kind: input, shape index: {}]   ;;  %s730_s5 = inlined_call_operand.vmem [shape: f32[1,128], index: 5, kind: input, shape index: {}]   ;;  %s731_s9 = inlined_call_operand.vmem [shape: f32[8,1], index: 9, kind: input, shape index: {}]   ;;  %s732_s7 = inlined_call_operand.vmem [shape: f32[1,128], index: 7, kind: input, shape index: {}]   ;;  %s733_s8 = inlined_call_operand.vmem [shape: bf16[8,128], index: 8, kind: input, shape index: {}]   ;;  %s734_s10 = inlined_call_operand.vmem [shape: f32[8,8], index: 10, kind: output, shape index: {}]  }
   0x1   :  { %538 = vset.pattern.permute.xlu0 %v554_v0  ;;  %v622_v1 = vld [vmem:[%s724_s0] sm:$0xff]  ;;  %484 = vmatprep.subr.bf16.mxu0 %v555_v2  ;;  %v541_v4 = vld [vmem:[%s725_s4 + $0x8] sm:$0xff]   ;;  %v544_v7 = vld [vmem:[%s726_s6 + $0x10] sm:$0xff]   ;;  %v558_v26 = vmov 2475754826   ;;  %vm229_vm13 = vcmask 1043456  }
   0x2   :  { %40 = vperm.xlu0 %538, %v622_v1   ;;  %v540_v3 = vld [vmem:[%s725_s4] sm:$0xff]   ;;  %488 = vmatprep.mubr.msk.bf16.mxu0 %vm556_vm0, %v555_v2  ;;  %v543_v6 = vld [vmem:[%s726_s6 + $0x8] sm:$0xff]   ;;  %v545_v8 = vld [vmem:[%s726_s6 + $0x18] sm:$0xff]   ;;  %v559_v29 = vmov 2131351028   ;;  %vm181_vm15 = vcmask 261120  }
   0x3   :  { %498 = vmatprep.subr.bf16.mxu1 %v555_v2  ;;  %514 = vmatprep.mubr.msk.bf16.mxu1 %vm556_vm0, %v555_v2  ;;  %v542_v5 = vld [vmem:[%s726_s6] sm:$0xff]   ;;  %v560_v32 = vmov 2102212464   ;;  %v561_v35 = vmov 920167782  }
   0x4   :  { %485 = vmatpush3.bf16.msra.mxu0 %v540_v3  ;;  %499 = vmatpush3.bf16.msra.mxu1 %v542_v5  ;;  %v448_v9 = vld [vmem:[%s727_s1] ss:$0 sm:$0xff]  ;;  %v562_v38 = vmov 1326507024  }
   0x5   :  { %486 = vmatprep.subr.bf16.mxu0 %v555_v2  ;;  %500 = vmatprep.subr.bf16.mxu1 %v555_v2  ;;  %v449_v10 = vld [vmem:[%s728_s2] ss:$0 sm:$0xff] }
   0x8   :  { %487 = vmatpush3.bf16.msra.mxu0 %v541_v4  ;;  %501 = vmatpush3.bf16.msra.mxu1 %v543_v6 }
   0x9   :  { %492 = vmatprep.subr.bf16.mxu0 %v555_v2  ;;  %502 = vmatprep.subr.bf16.mxu1 %v555_v2 }
   0xc   :  { %503 = vmatpush3.bf16.msra.mxu1 %v544_v7 }
   0xd   :  { %504 = vmatprep.subr.bf16.mxu1 %v555_v2 }
  0x10   :  { %505 = vmatpush3.bf16.msra.mxu1 %v545_v8 }
  0x11   :  { %506 = vmatprep.subr.bf16.mxu1 %v555_v2 }
  0x81   :  { %v41_v11 = vpop.permute.xlu0 %40 }
  0x82   :  { %v49_v12 = vmul.f32 %v448_v9, %v41_v11 }
  0x84   :  { %v661_v13 = vadd.f32 %v449_v10, %v49_v12 }
  0x86   :  { %v61_v14 = vand.u32 2139095040, %v661_v13  ;;  %v58_v18 = vand.u32 2147483647, %v661_v13  ;;  %vm60_vm8 = vcmp.lt.s32.totalorder %v661_v13, 0  ;;  %vm150_vm14 = vweird.f32 %v661_v13 }
  0x88   :  { %v62_v15 = vshrl.u32 %v61_v14, 23  ;;  %v65_v21 = vand.u32 8388607, %v58_v18  ;;  %vm59_vm9 = vcmp.le.f32.partialorder %v58_v18, 0.7853982 }
  0x89   :  { %v163_v18 = vld [vmem:[%s729_s3] sm:$0xf] }
  0x8a   :  { %v450_v16 = vadd.s32 4294967169, %v62_v15  ;;  %v66_v40 = vor.u32 8388608, %v65_v21 }
  0x8c   :  { %v68_v17 = vadd.s32 1, %v450_v16  ;;  %v106_v54 = vshll.u32 %v66_v40, 8 }
  0x8e   :  { %vm69_vm1 = vcmp.gt.s32.totalorder %v68_v17, 0 }
  0x8f   :  { %v70_v19 = vsel %vm69_vm1, %v68_v17, 0  ;;  %vm225_vm1 = vcmask 64512  }
  0x90   :  { %v72_v20 = vand.u32 31, %v70_v19  ;;  %v71_v23 = vshrl.u32 %v70_v19, 5 }
  0x92   :  { %v73_v22 = vsub.s32 32, %v72_v20  ;;  %v75_v25 = vshll.u32 %v557_v24, %v72_v20  ;;  %v78_v27 = vshll.u32 %v558_v26, %v72_v20  ;;  %v81_v31 = vshll.u32 %v559_v29, %v72_v20 }
  0x93   :  { %v84_v34 = vshll.u32 %v560_v32, %v72_v20  ;;  %v87_v37 = vshll.u32 %v561_v35, %v72_v20  ;;  %vm90_vm2 = vcmp.lt.s32.totalorder %v71_v23, 1  ;;  %vm93_vm3 = vcmp.lt.s32.totalorder %v71_v23, 4 }
  0x94   :  { %v76_v28 = vshrl.u32 %v558_v26, %v73_v22  ;;  %v79_v30 = vshrl.u32 %v559_v29, %v73_v22  ;;  %v82_v33 = vshrl.u32 %v560_v32, %v73_v22  ;;  %v85_v36 = vshrl.u32 %v561_v35, %v73_v22 }
  0x95   :  { %v88_v39 = vshrl.u32 %v562_v38, %v73_v22  ;;  %v74_v49 = vshrl.u32 %v557_v24, %v73_v22  ;;  %vm92_vm4 = vcmp.lt.s32.totalorder %v71_v23, 3  ;;  %vm91_vm5 = vcmp.lt.s32.totalorder %v71_v23, 2 }
  0x96   :  { %v77_v41 = vor.u32 %v76_v28, %v75_v25  ;;  %v80_v42 = vor.u32 %v79_v30, %v78_v27  ;;  %v83_v43 = vor.u32 %v82_v33, %v81_v31  ;;  %v86_v44 = vor.u32 %v85_v36, %v84_v34 }
  0x97   :  { %v89_v45 = vor.u32 %v88_v39, %v87_v37 }
  0x98   :  { %v95_v46 = vsel %vm93_vm3, %v83_v43, 2102212464  ;;  %v98_v47 = vsel %vm90_vm2, %v77_v41, %v80_v42  ;;  %v102_v48 = vsel %vm90_vm2, %v80_v42, %v83_v43  ;;  %v99_v50 = vsel %vm93_vm3, %v86_v44, 920167782 }
  0x99   :  { %v103_v51 = vsel %vm93_vm3, %v89_v45, 1326507024  ;;  %v100_v52 = vsel %vm92_vm4, %v83_v43, %v99_v50  ;;  %v94_v55 = vsel %vm90_vm2, %v74_v49, %v77_v41  ;;  %v96_v56 = vsel %vm92_vm4, %v80_v42, %v95_v46  ;;  %v549_v49 = vld [vmem:[%s726_s6 + $0x38] sm:$0xff]  }
  0x9a   :  { %v104_v53 = vsel %vm92_vm4, %v86_v44, %v103_v51  ;;  %v101_v57 = vsel %vm91_vm5, %v98_v47, %v100_v52  ;;  %v97_v63 = vsel %vm91_vm5, %v94_v55, %v96_v56  ;;  %v231_v46 = vsel %vm229_vm13, %v163_v18, 0  ;;  %v458_v55 = vld [vmem:[%s730_s5] ss:$0 sm:$0xff] }
  0x9b   :  { %v105_v58 = vsel %vm91_vm5, %v102_v48, %v104_v53  ;;  %v670_v61 = vmul.u32.u64.low %v106_v54, %v101_v57  ;;  %v671_v62 = vmul.u32.u64.high %v106_v54, %v101_v57, %v670_v61  ;;  %v113_v3 = vmul.u32 %v106_v54, %v97_v63  ;;  %v547_v48 = vld [vmem:[%s726_s6 + $0x28] sm:$0xff]   ;;  %v397_v63 = vld [vmem:[%s731_s9] sm:$0xff] }
  0x9c   :  { %v667_v59 = vmul.u32.u64.low %v106_v54, %v105_v58  ;;  %v668_v60 = vmul.u32.u64.high %v106_v54, %v105_v58, %v667_v59  ;;  %v162_v47 = vpack.c.bf16 %v622_v1, %v622_v1  ;;  %v548_v1 = vld [vmem:[%s726_s6 + $0x30] sm:$0xff]  }
  0x9d   :  { %v116_v0 = vadd.s32 1, %v671_v62 }
  0x9e   :  { %vm115_vm6 = vc.u32 %v668_v60, %v670_v61  ;;  %v114_v16 = vadd.s32 %v670_v61, %v668_v60 }
  0x9f   :  { %v117_v4 = vsel %vm115_vm6, %v116_v0, %v671_v62  ;;  %v563_v62 = vmov 0   ;;  %v459_v0 = vld [vmem:[%s732_s7] ss:$0 sm:$0xff] }
  0xa0   :  { %v118_v5 = vadd.s32 %v117_v4, %v113_v3  ;;  %539 = vset.pattern.permute.xlu0 %v563_v62 }
  0xa1   :  { %400 = vperm.xlu0 %539, %v397_v63  }
  0xa2   :  { %v119_v6 = vadd.s32 536870912, %v118_v5 }
  0xa4   :  { %v120_v7 = vshrl.u32 %v119_v6, 30 }
  0xa6   :  { %v121_v8 = vshll.u32 %v120_v7, 30  ;;  %v144_v29 = vsub.s32 4, %v120_v7 }
  0xa8   :  { %v122_v9 = vsub.s32 %v118_v5, %v121_v8  ;;  %v145_v32 = vsel %vm60_vm8, %v144_v29, %v120_v7 }
  0xa9   :  { %v147_v34 = vsel %vm59_vm9, 0, %v145_v32 }
  0xaa   :  { %v124_v10 = vsub.s32 0, %v122_v9  ;;  %v151_v35 = vadd.s32 3, %v147_v34 }
  0xac   :  { %v451_v11 = vmin.u32 %v124_v10, %v122_v9  ;;  %v152_v36 = vand.u32 3, %v151_v35  ;;  %v395_v10 = vld [vmem:[%s733_s8] sm:$0xf] }
  0xae   :  { %v126_v12 = vclz %v451_v11  ;;  %vm157_vm10 = vcmp.eq.s32.totalorder %v152_v36, 2  ;;  %vm154_vm11 = vcmp.eq.s32.totalorder %v152_v36, 0  ;;  %vm153_vm12 = vcmp.lt.s32.totalorder %v152_v36, 2 }
  0xb0   :  { %v452_v14 = vadd.s32 4294967294, %v126_v12 }
  0xb2   :  { %vm453_vm7 = vcmp.lt.s32.totalorder %v452_v14, 0 }
  0xb3   :  { %v129_v15 = vsel %vm453_vm7, 0, %v452_v14 }
  0xb4   :  { %v130_v17 = vsub.s32 32, %v129_v15  ;;  %v134_v19 = vsub.s32 4294967266, %v129_v15  ;;  %v131_v20 = vshll.u32 %v122_v9, %v129_v15 }
  0xb6   :  { %v132_v21 = vshrl.u32 %v114_v16, %v130_v17  ;;  %v135_v22 = vadd.s32 127, %v134_v19 }
  0xb8   :  { %v133_v23 = vor.u32 %v132_v21, %v131_v20  ;;  %v136_v24 = vshll.u32 %v135_v22, 23 }
  0xba   :  { %v137_v25 = vor.u32 4788187, %v136_v24  ;;  %v140_v27 = vcvt.s32.f32 %v133_v23 }
  0xbc   :  { %v138_v26 = vand.u32 2147483647, %v137_v25 }
  0xbe   :  { %v141_v28 = vmul.f32 %v140_v27, %v138_v26 }
  0xc0   :  { %v142_v30 = vxor.u32 2147483648, %v141_v28 }
  0xc2   :  { %v143_v31 = vsel %vm60_vm8, %v142_v30, %v141_v28 }
  0xc3   :  { %v146_v33 = vsel %vm59_vm9, %v661_v13, %v143_v31  ;;  %v546_v13 = vld [vmem:[%s726_s6 + $0x20] sm:$0xff]  }
  0xc4   :  { %550 = vcosq.f32 %v146_v33  ;;  %507 = vmatpush3.bf16.msra.mxu1 %v546_v13 }
  0xc5   :  { %552 = vsinq.f32 %v146_v33  ;;  %508 = vmatprep.subr.bf16.mxu1 %v555_v2 }
  0xc8   :  { %509 = vmatpush3.bf16.msra.mxu1 %v547_v48 }
  0xc9   :  { %510 = vmatprep.subr.bf16.mxu1 %v555_v2 }
  0xcc   :  { %511 = vmatpush3.bf16.msra.mxu1 %v548_v1 }
  0xcd   :  { %512 = vmatprep.subr.bf16.mxu1 %v555_v2 }
  0xce   :  { %v551_v37 = vpop.eup %550 }
  0xcf   :  { %v553_v38 = vpop.eup %552  ;;  %v158_v39 = vxor.u32 2147483648, %v551_v37 }
  0xd0   :  { %v155_v40 = vxor.u32 2147483648, %v553_v38  ;;  %513 = vmatpush3.bf16.msra.mxu1 %v549_v49 }
  0xd1   :  { %v159_v41 = vsel %vm157_vm10, %v158_v39, %v553_v38 }
  0xd2   :  { %v156_v42 = vsel %vm154_vm11, %v551_v37, %v155_v40 }
  0xd3   :  { %v160_v43 = vsel %vm153_vm12, %v156_v42, %v159_v41 }
  0xd4   :  { %v161_v44 = vsel %vm150_vm14, nan, %v160_v43 }
  0xd5   :  { %v164_v45 = vpack.c.bf16 %v161_v44, %v161_v44 }
  0xd7   :  { %489 = vmatmul.mubr.msk.bf16.vlgmr.msra.gmra.mrb[0].mxu0 %vm181_vm15, %v164_v45 }
  0xd8   :  { %493 = vmatpush3.bf16.msra.mxu0 %v231_v46  ;;  %494 = vmatprep.mubr.msk.bf16.mxu0 %vm556_vm0, %v555_v2 }
  0xd9   :  { %518 = vmatprep.subr.bf16.mxu0 %v555_v2 }
  0xdf   :  { %495 = vmatmul.mubr.msk.bf16.vlgmr.msra.gmra.mrb[4].mxu0 %vm225_vm1, %v162_v47 }
  0xe0   :  { %520 = vmatprep.mubr.msk.bf16.mxu0 %vm556_vm0, %v555_v2 }
 0x120   :  { %v401_v11 = vpop.permute.xlu0 %400 }
 0x1aa   :  { %v219_v50 = vpop.f32.mrb[0].mxu0 }
 0x1ab   :  { %v490_v51 = vpop.f32.mrb[1].mxu0 }
 0x1ac   :  { %v222_v52 = vpop.f32.mrb[2].mxu0 }
 0x1ad   :  { %v491_v53 = vpop.f32.mrb[3].mxu0 }
 0x1b2   :  { %v267_v54 = vpop.f32.mrb[4].mxu0 }
 0x1b3   :  { %v268_v56 = vadd.f32 %v267_v54, %v219_v50  ;;  %v496_v57 = vpop.f32.mrb[5].mxu0 }
 0x1b4   :  { %v270_v58 = vpop.f32.mrb[6].mxu0 }
 0x1b5   :  { %v280_v59 = vadd.f32 %v458_v55, %v268_v56  ;;  %v497_v60 = vpop.f32.mrb[7].mxu0 }
 0x1b7   :  { %v281_v2 = vmax.f32 %v280_v59, 0.0 }
 0x1b9   :  { %v282_v61 = vpack.c.bf16 %v281_v2, %v281_v2 }
 0x1bb   :  { %515 = vmatmul.mubr.bf16.vlgmr.msra.gmra.mrb[0].mxu1 %v282_v61 }
 0x28e   :  { %v388_v3 = vpop.f32.mrb[0].mxu1 }
 0x28f   :  { %v389_v4 = vadd.f32 %v459_v0, %v388_v3  ;;  %v516_v5 = vpop.f32.mrb[1].mxu1 }
 0x290   :  { %v391_v6 = vpop.f32.mrb[2].mxu1 }
 0x291   :  { %v394_v7 = vmax.f32 %v389_v4, 0.0  ;;  %v517_v8 = vpop.f32.mrb[3].mxu1 }
 0x293   :  { %v396_v9 = vpack.c.bf16 %v394_v7, %v394_v7 }
 0x295   :  { %519 = vmatpush3.bf16.xpose.msra.mxu0 %v396_v9 }
 0x29c   :  { %521 = vmatmul.mubr.bf16.vlgmr.msra.gmra.mrb[8].mxu0 %v395_v10 }
 0x36f   :  { %v437_v12 = vpop.f32.mrb[8].mxu0 }
 0x370   :  { %v438_v14 = vadd.f32 %v437_v12, %v401_v11  ;;  %v522_v15 = vpop.f32.mrb[9].mxu0 }
 0x371   :  { %v440_v16 = vpop.f32.mrb[10].mxu0 }
 0x372   :  { %443 = vst.msk [vmem:[%s734_s10] sm:$0xff] %vm225_vm1, %v438_v14  ;;  %v523_v17 = vpop.f32.mrb[11].mxu0 }

</bundles_post_ra>
